<compile_context>
chip_gen: v7x
topology: tpu7x:2x2x1
jax: 0.10.0
libtpu: 0.0.40
codegen_flags: <defaults>
</compile_context>

<pallas_src>
import functools

import jax
import jax.numpy as jnp
from jax.experimental import pallas as pl
from jax.experimental.pallas import tpu as pltpu

BN_EPS = 1e-5
# Set to jnp.bfloat16 for ~3-8x MXU throughput and half the x/W VMEM footprint.
MATMUL_DTYPE = None


def _cdiv(a, b):
    return (a + b - 1) // b


def _round_up(x, m):
    return _cdiv(x, m) * m


def _vmem_capacity_bytes():
    try:
        cap = getattr(pltpu.get_tpu_info(), "vmem_capacity_bytes", None)
        if cap:
            return int(cap)
    except Exception:
        pass
    return 64 << 20  # conservative default (v7x per-core VMEM)


def _choose_tiling(N, Din, E):
    """Static tile / VMEM-budget selection (per TPU generation)."""
    cap = _vmem_capacity_bytes()
    budget = (cap * 3) // 4          # headroom for compiler scratch
    itm = 4                          # f32 operands in VMEM

    # Channel tile: full E when the layout forces it (E % 128 != 0) or when W fits
    # fully VMEM-resident; otherwise the largest 128-multiple slab that fits.
    if E % 128 != 0 or 2 * Din * E * itm <= budget // 2:
        te = E
    else:
        te = 128
        for cand in (512, 256):
            if E % cand == 0 and 2 * Din * cand * itm <= budget // 2:
                te = cand
                break
    num_e = _cdiv(E, te)

    # Row tile: as large as the remaining (double-buffered) budget allows.
    w_bytes = 2 * Din * te * itm
    rem = max(budget - w_bytes, budget // 4)
    per_row = 2 * (Din + te) * itm           # x tile + out tile, double buffered
    tn_max = 1024 if cap <= (64 << 20) else 2048
    tn = max(8, min(tn_max, (rem // per_row) // 8 * 8))
    num_n = _cdiv(N, tn)
    tn = min(tn, _round_up(_cdiv(N, num_n), 8))   # minimise last-tile waste
    num_n = _cdiv(N, tn)

    need = 2 * itm * (tn * Din + Din * te + tn * te + 4 * 8 * te) + (4 << 20)
    vmem_limit = int(min(max(budget, need), cap - (2 << 20)))
    return te, num_e, tn, num_n, vmem_limit


# ---------------------------------------------------------------------------
# Phase 1: per-tile matmul + streaming accumulation of per-channel sum / sumsq.
# grid = (NS, num_e, num_n_s); reduction (row-tile) axis last, "arbitrary".
# ---------------------------------------------------------------------------
def _stats_kernel(x_ref, w_ref, sum_ref, sumsq_ref, *,
                  tn, n_rows, num_n_s, needs_mask, matmul_dtype):
    n = pl.program_id(2)

    @pl.when(n == 0)
    def _init():
        sum_ref[...] = jnp.zeros_like(sum_ref)
        sumsq_ref[...] = jnp.zeros_like(sumsq_ref)

    x = x_ref[...]
    if needs_mask:
        # Zero rows beyond the real N (partial last tile / duplicated dummy tiles)
        # so they contribute nothing to the statistics.
        t = pl.program_id(0) * num_n_s + n            # global row-tile index
        valid = n_rows - t * tn
        rows = jax.lax.broadcasted_iota(jnp.int32, x.shape, 0)
        x = jnp.where(rows < valid, x, 0.0)
    w = w_ref[...]
    if matmul_dtype is not None:
        x = x.astype(matmul_dtype)
        w = w.astype(matmul_dtype)

    y = jnp.dot(x, w, preferred_element_type=jnp.float32)      # (tn, te) on MXU
    te = y.shape[-1]
    y3 = y.reshape(-1, 8, te)           # sublane-aligned strips -> VPU adds only
    sum_ref[...] += jnp.sum(y3, axis=0)
    sumsq_ref[...] += jnp.sum(y3 * y3, axis=0)


# ---------------------------------------------------------------------------
# Phase 2: recompute per-tile matmul, apply BN scale/shift + ReLU.
# grid = (num_n, num_e); all tiles independent -> fully parallel.
# ---------------------------------------------------------------------------
def _apply_kernel(x_ref, w_ref, scale_ref, shift_ref, o_ref, *, matmul_dtype):
    x = x_ref[...]
    w = w_ref[...]
    if matmul_dtype is not None:
        x = x.astype(matmul_dtype)
        w = w.astype(matmul_dtype)
    y = jnp.dot(x, w, preferred_element_type=jnp.float32)
    o_ref[...] = jnp.maximum(
        y * scale_ref[...] + shift_ref[...], 0.0).astype(o_ref.dtype)


@jax.jit
def v_encoder_forward(src, w, b, gamma, beta):
    """src: (B, T, Din); w: (Din, E) (transposed PyTorch weight); gamma/beta: (1, E).

    The Linear bias `b` is accepted for interface fidelity but is cancelled
    exactly by the training-mode BatchNorm mean subtraction, so it is unused.
    """
    # TODO(synk): if BN were run in eval mode (running stats) the bias would NOT
    # cancel; this kernel implements the module's training-mode forward.
    del b
    B, T, Din = src.shape
    E = w.shape[1]
    N = B * T
    x2d = src.reshape(N, Din)            # free view; no host-side padding

    te, num_e, tn, num_n, vmem_limit = _choose_tiling(N, Din, E)
    ns = 2 if num_n >= 2 else 1          # >=2 parallel phase-1 blocks for v7x 2 TCs
    num_n_s = _cdiv(num_n, ns)
    needs_mask = (N % tn != 0) or (ns * num_n_s != num_n)

    # ---- Phase 1: per-channel sum / sum-of-squares of y = x @ W ---------------
    stats_kernel = functools.partial(
        _stats_kernel, tn=tn, n_rows=N, num_n_s=num_n_s,
        needs_mask=needs_mask, matmul_dtype=MATMUL_DTYPE)

    sum_part, sumsq_part = pl.pallas_call(
        stats_kernel,
        out_shape=(jax.ShapeDtypeStruct((ns * 8, E), jnp.float32),
                   jax.ShapeDtypeStruct((ns * 8, E), jnp.float32)),
        grid_spec=pltpu.PrefetchScalarGridSpec(
            num_scalar_prefetch=0,
            grid=(ns, num_e, num_n_s),
            in_specs=[
                pl.BlockSpec(
                    (tn, Din),
                    lambda s, e, n: (jnp.minimum(s * num_n_s + n, num_n - 1), 0)),
                pl.BlockSpec((Din, te), lambda s, e, n: (0, e)),
            ],
            out_specs=[
                pl.BlockSpec((8, te), lambda s, e, n: (s, e)),
                pl.BlockSpec((8, te), lambda s, e, n: (s, e)),
            ]),
        compiler_params=pltpu.CompilerParams(
            dimension_semantics=("parallel", "parallel", "arbitrary"),
            vmem_limit_bytes=vmem_limit),
    )(x2d, w)

    # ---- Fold statistics into per-channel scale/shift (tiny (E,) vectors) -----
    inv_n = 1.0 / N
    sum_c = jnp.sum(sum_part, axis=0)
    sumsq_c = jnp.sum(sumsq_part, axis=0)
    mean = sum_c * inv_n
    # TODO(synk): E[y^2]-E[y]^2 can lose precision when |mean| >> std; a shifted /
    # two-pass variance would be more robust.  Guarded against negative values.
    var = jnp.maximum(sumsq_c * inv_n - mean * mean, 0.0)
    inv_std = jax.lax.rsqrt(var + BN_EPS)
    g = gamma.reshape(-1)
    scale = (g * inv_std).reshape(1, E).astype(jnp.float32)
    shift = (beta.reshape(-1) - mean * g * inv_std).reshape(1, E).astype(jnp.float32)

    # ---- Phase 2: recompute y per tile, apply scale/shift + ReLU ---------------
    apply_kernel = functools.partial(_apply_kernel, matmul_dtype=MATMUL_DTYPE)
    out2d = pl.pallas_call(
        apply_kernel,
        out_shape=jax.ShapeDtypeStruct((N, E), src.dtype),
        grid_spec=pltpu.PrefetchScalarGridSpec(
            num_scalar_prefetch=0,
            grid=(num_n, num_e),
            in_specs=[
                pl.BlockSpec((tn, Din), lambda n, e: (n, 0)),
                # Constant block index when num_e == 1 -> W is DMA'd once and stays
                # VMEM-resident for the whole grid.
                pl.BlockSpec((Din, te), lambda n, e: (0, e)),
                pl.BlockSpec((1, te), lambda n, e: (0, e)),
                pl.BlockSpec((1, te), lambda n, e: (0, e)),
            ],
            out_specs=pl.BlockSpec((tn, te), lambda n, e: (n, e))),
        compiler_params=pltpu.CompilerParams(
            dimension_semantics=("parallel", "parallel"),
            vmem_limit_bytes=vmem_limit),
    )(x2d, w, scale, shift)

    return out2d.reshape(B, T, E)


def init_params(key, input_size, embedding_dim):
    # nn.Linear weight: xavier_uniform_ with gain = calculate_gain('relu') = sqrt(2).
    kw, kb = jax.random.split(key)
    gain = 2.0 ** 0.5
    bound_w = gain * (6.0 / (input_size + embedding_dim)) ** 0.5
    # PyTorch Linear weight is (E, Din); we store its transpose (Din, E) so the
    # kernel computes x @ W directly.
    w_t = jax.random.uniform(kw, (input_size, embedding_dim),
                             minval=-bound_w, maxval=bound_w, dtype=jnp.float32)
    # nn.Linear default bias init: U(-1/sqrt(fan_in), 1/sqrt(fan_in)).
    bound_b = 1.0 / (input_size ** 0.5)
    b = jax.random.uniform(kb, (1, embedding_dim),
                           minval=-bound_b, maxval=bound_b, dtype=jnp.float32)
    # BatchNorm1d: weight = 1, bias = 0 (per the module's init loop).
    gamma = jnp.ones((1, embedding_dim), jnp.float32)
    beta = jnp.zeros((1, embedding_dim), jnp.float32)
    return w_t, b, gamma, beta


def reference_forward(src, w, b, gamma, beta):
    # Pure-JAX reference mirroring the PyTorch forward (training-mode BN stats,
    # including the Linear bias -- the kernel omits it since BN cancels it exactly).
    y = jnp.einsum("btd,de->bte", src, w,
                   precision=jax.lax.Precision.HIGHEST) + b[0]
    mean = jnp.mean(y, axis=(0, 1), keepdims=True)
    var = jnp.mean((y - mean) ** 2, axis=(0, 1), keepdims=True)
    y_bn = (y - mean) / jnp.sqrt(var + BN_EPS) * gamma[0] + beta[0]
    return jnp.maximum(y_bn, 0.0)


# TODO(synk): BatchNorm1d running_mean/running_var buffer updates (a training-time
# side effect, not part of the forward output) are not materialized.

if __name__ == "__main__":
    B, T = 2, 8
    input_size = 16
    embedding_dim = 32

    key = jax.random.PRNGKey(0)
    k_x, k_p = jax.random.split(key)
    src = jax.random.normal(k_x, (B, T, input_size), dtype=jnp.float32)
    w, b, gamma, beta = init_params(k_p, input_size, embedding_dim)

    out = v_encoder_forward(src, w, b, gamma, beta)
    out = jax.block_until_ready(out)

    ref = reference_forward(src, w, b, gamma, beta)
    assert out.shape == (B, T, embedding_dim)
    # Tolerance leaves margin for MXU multi-pass f32 matmul rounding differences
    # between the Mosaic kernel and the HIGHEST-precision XLA reference.
    assert jnp.allclose(out, ref, atol=1e-3, rtol=1e-3), "mismatch vs reference"

    print("KERNEL_OK")
</pallas_src>

<mosaic_0001>
module attributes {stable_mosaic.version = 11 : i64} {
  func.func @_apply_kernel(%arg0: i32, %arg1: i32, %arg2: memref<16x16xf32, #tpu.memory_space<vmem>>, %arg3: memref<16x32xf32, #tpu.memory_space<vmem>>, %arg4: memref<1x32xf32, #tpu.memory_space<vmem>>, %arg5: memref<1x32xf32, #tpu.memory_space<vmem>>, %arg6: memref<16x32xf32, #tpu.memory_space<vmem>>) attributes {dimension_semantics = [#tpu.dimension_semantics<parallel>, #tpu.dimension_semantics<parallel>], iteration_bounds = array<i64: 1, 1>, scalar_prefetch = 0 : i64, scratch_operands = 0 : i64, tpu.core_type = #tpu.core_type<tc>, window_params = [{transform_indices = @transform_0, window_bounds = array<i64: 16, 16>}, {transform_indices = @transform_1, window_bounds = array<i64: 16, 32>}, {transform_indices = @transform_2, window_bounds = array<i64: 1, 32>}, {transform_indices = @transform_3, window_bounds = array<i64: 1, 32>}, {transform_indices = @transform_4, window_bounds = array<i64: 16, 32>}]} {
    %c0 = arith.constant 0 : index
    %c0_0 = arith.constant 0 : index
    %0 = vector.load %arg2[%c0, %c0_0] : memref<16x16xf32, #tpu.memory_space<vmem>>, vector<16x16xf32>
    %c0_1 = arith.constant 0 : index
    %c0_2 = arith.constant 0 : index
    %1 = vector.load %arg3[%c0_1, %c0_2] : memref<16x32xf32, #tpu.memory_space<vmem>>, vector<16x32xf32>
    %cst = arith.constant dense<0.000000e+00> : vector<16x32xf32>
    %2 = tpu.matmul %0, %1, %cst {dimension_numbers = #tpu.dot_dimension_numbers<[1], [0], [0], [1], [0, 0, 1, 1], [], []>} : vector<16x16xf32>, vector<16x32xf32>, vector<16x32xf32> -> vector<16x32xf32>
    %c0_3 = arith.constant 0 : index
    %c0_4 = arith.constant 0 : index
    %3 = vector.load %arg4[%c0_3, %c0_4] : memref<1x32xf32, #tpu.memory_space<vmem>>, vector<1x32xf32>
    %4 = vector.broadcast %3 : vector<1x32xf32> to vector<16x32xf32>
    %5 = arith.mulf %2, %4 : vector<16x32xf32>
    %c0_5 = arith.constant 0 : index
    %c0_6 = arith.constant 0 : index
    %6 = vector.load %arg5[%c0_5, %c0_6] : memref<1x32xf32, #tpu.memory_space<vmem>>, vector<1x32xf32>
    %7 = vector.broadcast %6 : vector<1x32xf32> to vector<16x32xf32>
    %8 = arith.addf %5, %7 : vector<16x32xf32>
    %cst_7 = arith.constant 0.000000e+00 : f32
    %9 = vector.broadcast %cst_7 : f32 to vector<16x32xf32>
    %10 = arith.maximumf %8, %9 : vector<16x32xf32>
    %c0_8 = arith.constant 0 : index
    %c0_9 = arith.constant 0 : index
    %11 = vector.load %arg6[%c0_8, %c0_9] : memref<16x32xf32, #tpu.memory_space<vmem>>, vector<16x32xf32>
    tpu.vector_store %arg6[%c0_8, %c0_9], %10 {strides = array<i32>} : memref<16x32xf32, #tpu.memory_space<vmem>>, vector<16x32xf32>,
    return
  }
  func.func @transform_0(%arg0: i32, %arg1: i32) -> (i32, i32) {
    %c0_i32 = arith.constant 0 : i32
    %c0_i32_0 = arith.constant 0 : i32
    return %arg0, %c0_i32 : i32, i32
  }
  func.func @transform_1(%arg0: i32, %arg1: i32) -> (i32, i32) {
    %c0_i32 = arith.constant 0 : i32
    %c0_i32_0 = arith.constant 0 : i32
    return %c0_i32, %arg1 : i32, i32
  }
  func.func @transform_2(%arg0: i32, %arg1: i32) -> (i32, i32) {
    %c0_i32 = arith.constant 0 : i32
    %c0_i32_0 = arith.constant 0 : i32
    return %c0_i32, %arg1 : i32, i32
  }
  func.func @transform_3(%arg0: i32, %arg1: i32) -> (i32, i32) {
    %c0_i32 = arith.constant 0 : i32
    %c0_i32_0 = arith.constant 0 : i32
    return %c0_i32, %arg1 : i32, i32
  }
  func.func @transform_4(%arg0: i32, %arg1: i32) -> (i32, i32) {
    %c0_i32 = arith.constant 0 : i32
    return %arg0, %arg1 : i32, i32
  }
}

module attributes {stable_mosaic.version = 11 : i64} {
  func.func @_stats_kernel(%arg0: i32, %arg1: i32, %arg2: i32, %arg3: memref<16x16xf32, #tpu.memory_space<vmem>>, %arg4: memref<16x32xf32, #tpu.memory_space<vmem>>, %arg5: memref<8x32xf32, #tpu.memory_space<vmem>>, %arg6: memref<8x32xf32, #tpu.memory_space<vmem>>) attributes {dimension_semantics = [#tpu.dimension_semantics<parallel>, #tpu.dimension_semantics<parallel>, #tpu.dimension_semantics<arbitrary>], iteration_bounds = array<i64: 1, 1, 1>, scalar_prefetch = 0 : i64, scratch_operands = 0 : i64, tpu.core_type = #tpu.core_type<tc>, window_params = [{transform_indices = @transform_0, window_bounds = array<i64: 16, 16>}, {transform_indices = @transform_1, window_bounds = array<i64: 16, 32>}, {transform_indices = @transform_2, window_bounds = array<i64: 8, 32>}, {transform_indices = @transform_3, window_bounds = array<i64: 8, 32>}]} {
    %c0_i32 = arith.constant 0 : i32
    %0 = arith.cmpi eq, %arg2, %c0_i32 : i32
    %1 = arith.extui %0 : i1 to i32
    %c0_i32_0 = arith.constant 0 : i32
    %2 = arith.cmpi ne, %1, %c0_i32_0 : i32
    scf.if %2 {
      %cst_14 = arith.constant 0.000000e+00 : f32
      %16 = vector.broadcast %cst_14 : f32 to vector<8x32xf32>
      %c0_15 = arith.constant 0 : index
      %c0_16 = arith.constant 0 : index
      %17 = vector.load %arg5[%c0_15, %c0_16] : memref<8x32xf32, #tpu.memory_space<vmem>>, vector<8x32xf32>
      tpu.vector_store %arg5[%c0_15, %c0_16], %16 {strides = array<i32>} : memref<8x32xf32, #tpu.memory_space<vmem>>, vector<8x32xf32>,
      %cst_17 = arith.constant 0.000000e+00 : f32
      %18 = vector.broadcast %cst_17 : f32 to vector<8x32xf32>
      %c0_18 = arith.constant 0 : index
      %c0_19 = arith.constant 0 : index
      %19 = vector.load %arg6[%c0_18, %c0_19] : memref<8x32xf32, #tpu.memory_space<vmem>>, vector<8x32xf32>
      tpu.vector_store %arg6[%c0_18, %c0_19], %18 {strides = array<i32>} : memref<8x32xf32, #tpu.memory_space<vmem>>, vector<8x32xf32>,
    } else {
    }
    %c0 = arith.constant 0 : index
    %c0_1 = arith.constant 0 : index
    %3 = vector.load %arg3[%c0, %c0_1] : memref<16x16xf32, #tpu.memory_space<vmem>>, vector<16x16xf32>
    %c0_2 = arith.constant 0 : index
    %c0_3 = arith.constant 0 : index
    %4 = vector.load %arg4[%c0_2, %c0_3] : memref<16x32xf32, #tpu.memory_space<vmem>>, vector<16x32xf32>
    %cst = arith.constant dense<0.000000e+00> : vector<16x32xf32>
    %5 = tpu.matmul %3, %4, %cst {dimension_numbers = #tpu.dot_dimension_numbers<[1], [0], [0], [1], [0, 0, 1, 1], [], []>} : vector<16x16xf32>, vector<16x32xf32>, vector<16x32xf32> -> vector<16x32xf32>
    %6 = vector.shape_cast %5 : vector<16x32xf32> to vector<2x8x32xf32>
    %c0_4 = arith.constant 0 : index
    %c0_5 = arith.constant 0 : index
    %7 = vector.load %arg5[%c0_4, %c0_5] : memref<8x32xf32, #tpu.memory_space<vmem>>, vector<8x32xf32>
    %cst_6 = arith.constant dense<0.000000e+00> : vector<8x32xf32>
    %8 = vector.multi_reduction <add>, %6, %cst_6 [0] : vector<2x8x32xf32> to vector<8x32xf32>
    %9 = arith.addf %7, %8 : vector<8x32xf32>
    %c0_7 = arith.constant 0 : index
    %c0_8 = arith.constant 0 : index
    %10 = vector.load %arg5[%c0_7, %c0_8] : memref<8x32xf32, #tpu.memory_space<vmem>>, vector<8x32xf32>
    tpu.vector_store %arg5[%c0_7, %c0_8], %9 {strides = array<i32>} : memref<8x32xf32, #tpu.memory_space<vmem>>, vector<8x32xf32>,
    %c0_9 = arith.constant 0 : index
    %c0_10 = arith.constant 0 : index
    %11 = vector.load %arg6[%c0_9, %c0_10] : memref<8x32xf32, #tpu.memory_space<vmem>>, vector<8x32xf32>
    %12 = arith.mulf %6, %6 : vector<2x8x32xf32>
    %cst_11 = arith.constant dense<0.000000e+00> : vector<8x32xf32>
    %13 = vector.multi_reduction <add>, %12, %cst_11 [0] : vector<2x8x32xf32> to vector<8x32xf32>
    %14 = arith.addf %11, %13 : vector<8x32xf32>
    %c0_12 = arith.constant 0 : index
    %c0_13 = arith.constant 0 : index
    %15 = vector.load %arg6[%c0_12, %c0_13] : memref<8x32xf32, #tpu.memory_space<vmem>>, vector<8x32xf32>
    tpu.vector_store %arg6[%c0_12, %c0_13], %14 {strides = array<i32>} : memref<8x32xf32, #tpu.memory_space<vmem>>, vector<8x32xf32>,
    return
  }
  func.func @transform_0(%arg0: i32, %arg1: i32, %arg2: i32) -> (i32, i32) {
    %c1_i32 = arith.constant 1 : i32
    %0 = arith.muli %arg0, %c1_i32 : i32
    %1 = arith.addi %0, %arg2 : i32
    %c0_i32 = arith.constant 0 : i32
    %2 = arith.minsi %1, %c0_i32 : i32
    %c0_i32_0 = arith.constant 0 : i32
    %c0_i32_1 = arith.constant 0 : i32
    return %2, %c0_i32_0 : i32, i32
  }
  func.func @transform_1(%arg0: i32, %arg1: i32, %arg2: i32) -> (i32, i32) {
    %c0_i32 = arith.constant 0 : i32
    %c0_i32_0 = arith.constant 0 : i32
    return %c0_i32, %arg1 : i32, i32
  }
  func.func @transform_2(%arg0: i32, %arg1: i32, %arg2: i32) -> (i32, i32) {
    %c0_i32 = arith.constant 0 : i32
    return %arg0, %arg1 : i32, i32
  }
  func.func @transform_3(%arg0: i32, %arg1: i32, %arg2: i32) -> (i32, i32) {
    %c0_i32 = arith.constant 0 : i32
    return %arg0, %arg1 : i32, i32
  }
}

</mosaic_0001>

<bundles_post_ra>
// kernel: v_encoder_forward.3
= control target key start
LH: loop header
LB: loop body
LE: loop exit
PB: predicated region body
PF: predicated region fallthrough
CT: control target
= control target key end

     0   :  { %vm22_vm0 = vcmask 130048   ;;  %s247_s0 = inlined_call_operand.vmem [shape: f32[16,16], index: 0, kind: input, shape index: {}]   ;;  %s248_s1 = inlined_call_operand.vmem [shape: f32[16,32], index: 1, kind: input, shape index: {}]   ;;  %s249_s2 = inlined_call_operand.vmem [shape: f32[1,32], index: 2, kind: input, shape index: {}]   ;;  %s250_s3 = inlined_call_operand.vmem [shape: f32[1,32], index: 3, kind: input, shape index: {}]   ;;  %s251_s4 = inlined_call_operand.hbm [shape: f32[16,32], index: 4, kind: output, shape index: {}]  }
   0x1   :  { %v20_v0 = vld [vmem:[%s248_s1] sm:$0xff]  ;;  %v21_v1 = vld [vmem:[%s248_s1 + $0x8] sm:$0xff] }
   0x2   :  { %v18_v2 = vld [vmem:[%s247_s0] sm:$0xff]  ;;  %v158_v3 = vpack.c.bf16 %v21_v1, %v20_v0 }
   0x3   :  { %155 = vmatprep.mubr.msk.f32.mxu0 %vm22_vm0, %v18_v2 }
   0x4   :  { %9 = vsyncpa [#allocation3], 0  ;;  %159 = vmatprep.subr.bf16.mxu0 %v158_v3  ;;  %v19_v4 = vld [vmem:[%s247_s0 + $0x8] sm:$0xff]  ;;  %v145_v5 = vld [vmem:[%s249_s2] ss:$0 sm:$0xff]  ;;  %s189_s26 = smov [#allocation2]  }
   0x5   :  { %161 = vmatpush3.bf16.msra.mxu0 %v158_v3  ;;  %v146_v7 = vld [vmem:[%s250_s3] ss:$0 sm:$0xff]  ;;  %s132_s27 = sshll.u32 %s189_s26, 4  ;;  %vm124_vm1 = vcmask 261120   ;;  %s133_s27 = int_to_ptr.vmem [resolvable:$true] %s132_s27 }
   0x6   :  { %s165_s0 = scalar_lea.vmem %s133_s27, 256  ;;  %p170_p1 = scmp.lt.s32.totalorder %s133_s27, %s133_s27 }
   0x7   :  { %p166_p0 = scmp.ne.s32.totalorder %s133_s27, %s165_s0  ;;  %p171_p2 = scmp.lt.s32.totalorder %s165_s0, %s165_s0 }
   0x8   :  { %156 = vmatmul.mubr.msk.f32.vlgmr.msra.gmra.mrb[0].mxu0 %vm22_vm0, %v19_v4 }
   0x9   :  { %p172_p3 = por %p171_p2, %p170_p1 }
   0xb   :  { %p173_p4 = pnand %p172_p3, %p166_p0 }
  0xdb   :  { %v157_v6 = vpop.f32.mrb[0].mxu0 }
  0xdc   :  { %v112_v8 = vmul.f32 %v157_v6, %v145_v5  ;;  %v95_v9 = vpop.f32.mrb[1].mxu0 }
  0xdd   :  { %v111_v10 = vmul.f32 %v145_v5, %v95_v9 }
  0xde   :  { %v121_v11 = vadd.f32 %v146_v7, %v112_v8 }
  0xdf   :  { %v120_v12 = vadd.f32 %v146_v7, %v111_v10 }
  0xe0   :  { %v123_v13 = vmax.f32 %v121_v11, 0.0 }
  0xe1   :  { %v122_v14 = vmax.f32 %v120_v12, 0.0 }
  0xe2   :  { %126 = vst.msk [vmem:[#allocation2 + $0x8] sm:$0xff] %vm124_vm1, %v123_v13 }
  0xe3   :  { %125 = vst.msk [vmem:[#allocation2] sm:$0xff] %vm124_vm1, %v122_v14 }
  0xe4   :  { %176 = shalt.err (!%p173_p4)
}
  0xe5   :  { %s177_s28 = scalar_lea.hbm %s251_s4, 256 }
  0xe6   :  { %p178_p5 = scmp.ne.s32.totalorder %s251_s4, %s177_s28  ;;  %p181_p6 = scmp.lt.u32.totalorder %s177_s28, %s251_s4 }
  0xe8   :  { %p183_p7 = pnand %p181_p6, %p178_p5 }
  0xea   :  { %186 = shalt.err (!%p183_p7)
}
  0xeb   :  { %s190_s7 = smov 128   ;;  %s191_s8 = smov 8  }
  0xec   :  { %138 = dma.vmem_to_hbm [thread:$0]  %s133_s27, 256, %s251_s4, [#allocation3], %s190_s7, %s190_s7, %s191_s8  }
  0xed   :  { %187 = dma.done.wait [#allocation3], 256  }
  0xee   :  { %188 = vsyncadd [#allocation3], 4294967040 }
  0xef   :  { %142 = vsyncpa [#allocation3], 1 }

// kernel: v_encoder_forward.2
= control target key start
LH: loop header
LB: loop body
LE: loop exit
PB: predicated region body
PF: predicated region fallthrough
CT: control target
= control target key end

     0   :  { %9 = vsyncpa [#allocation3], 0  ;;  %s316_s0 = inlined_call_operand.hbm [shape: f32[16,16], index: 0, kind: input, shape index: {}]   ;;  %s317_s1 = inlined_call_operand.hbm [shape: f32[16,32], index: 1, kind: input, shape index: {}]   ;;  %s318_s2 = inlined_call_operand.vmem [shape: f32[8,32], index: 2, kind: output, shape index: {0}]   ;;  %s319_s3 = inlined_call_operand.vmem [shape: f32[8,32], index: 3, kind: output, shape index: {1}]  }
   0x1   :  { %10 = vsyncpa [#allocation5], 0  ;;  %s241_s12 = smov [#allocation2]   ;;  %s193_s16 = scalar_lea.hbm %s316_s0, 256 }
   0x2   :  { %s22_s13 = sshll.u32 %s241_s12, 4  ;;  %p194_p0 = scmp.ne.s32.totalorder %s316_s0, %s193_s16  ;;  %s23_s13 = int_to_ptr.vmem [resolvable:$true] %s22_s13 }
   0x3   :  { %p197_p1 = scmp.lt.u32.totalorder %s193_s16, %s316_s0 }
   0x5   :  { %p199_p2 = pnand %p197_p1, %p194_p0 }
   0x7   :  { %202 = shalt.err (!%p199_p2)
}
   0x8   :  { %s203_s21 = scalar_lea.vmem %s23_s13, 256  ;;  %p208_p4 = scmp.lt.s32.totalorder %s23_s13, %s23_s13 }
   0x9   :  { %p204_p3 = scmp.ne.s32.totalorder %s23_s13, %s203_s21  ;;  %p209_p5 = scmp.lt.s32.totalorder %s203_s21, %s203_s21 }
   0xb   :  { %p210_p6 = por %p209_p5, %p208_p4 }
   0xd   :  { %p211_p7 = pnand %p210_p6, %p204_p3 }
   0xf   :  { %214 = shalt.err (!%p211_p7)
}
  0x10   :  { %s242_s22 = smov 128   ;;  %s243_s23 = smov 8  }
  0x11   :  { %28 = dma.hbm_to_vmem [thread:$0]  %s316_s0, 256, %s23_s13, [#allocation3], %s242_s22, %s242_s22, %s243_s23  }
  0x12   :  { %s244_s26 = smov [#allocation4]   ;;  %s215_s30 = scalar_lea.hbm %s317_s1, 256 }
  0x13   :  { %s34_s27 = sshll.u32 %s244_s26, 4  ;;  %p216_p8 = scmp.ne.s32.totalorder %s317_s1, %s215_s30  ;;  %s35_s27 = int_to_ptr.vmem [resolvable:$true] %s34_s27 }
  0x14   :  { %p219_p9 = scmp.lt.u32.totalorder %s215_s30, %s317_s1 }
  0x16   :  { %p221_p10 = pnand %p219_p9, %p216_p8 }
  0x18   :  { %224 = shalt.err (!%p221_p10)
}
  0x19   :  { %s225_s8 = scalar_lea.vmem %s35_s27, 256  ;;  %p230_p12 = scmp.lt.s32.totalorder %s35_s27, %s35_s27 }
  0x1a   :  { %p226_p11 = scmp.ne.s32.totalorder %s35_s27, %s225_s8  ;;  %p231_p13 = scmp.lt.s32.totalorder %s225_s8, %s225_s8 }
  0x1c   :  { %p232_p0 = por %p231_p13, %p230_p12 }
  0x1e   :  { %p233_p1 = pnand %p232_p0, %p226_p11 }
  0x20   :  { %236 = shalt.err (!%p233_p1)
}
  0x21   :  { %40 = dma.hbm_to_vmem [thread:$0]  %s317_s1, 256, %s35_s27, [#allocation5], %s242_s22, %s242_s22, %s243_s23  }
  0x22   :  { %237 = dma.done.wait [#allocation3], 256  }
  0x23   :  { %238 = vsyncadd [#allocation3], 4294967040 }
  0x24   :  { %239 = dma.done.wait [#allocation5], 256  }
  0x25   :  { %240 = vsyncadd [#allocation5], 4294967040  ;;  %vm62_vm0 = vcmask 130048   ;;  %v60_v0 = vld [vmem:[#allocation4] sm:$0xff]  ;;  %v61_v1 = vld [vmem:[#allocation4 + $0x8] sm:$0xff]  ;;  %vm55_vm1 = vcmask 261120  }
  0x26   :  { %v58_v2 = vld [vmem:[#allocation2] sm:$0xff]  ;;  %v184_v3 = vpack.c.bf16 %v61_v1, %v60_v0  ;;  %v59_v4 = vld [vmem:[#allocation2 + $0x8] sm:$0xff]  ;;  %v245_v5 = vmov 0.0  }
  0x27   :  { %181 = vmatprep.mubr.msk.f32.mxu0 %vm62_vm0, %v58_v2  ;;  %56 = vst.msk [vmem:[%s318_s2] sm:$0xff] %vm55_vm1, %v245_v5  ;;  %57 = vst.msk [vmem:[%s319_s3] sm:$0xff] %vm55_vm1, %v245_v5 }
  0x28   :  { %185 = vmatprep.subr.bf16.mxu0 %v184_v3 }
  0x29   :  { %187 = vmatpush3.bf16.msra.mxu0 %v184_v3 }
  0x2c   :  { %182 = vmatmul.mubr.msk.f32.vlgmr.msra.gmra.mrb[0].mxu0 %vm62_vm0, %v59_v4 }
  0x2e   :  { %v144_v10 = vld [vmem:[%s318_s2] sm:$0xff] }
  0x2f   :  { %v151_v15 = vld [vmem:[%s319_s3] sm:$0xff] }
  0xff   :  { %v183_v6 = vpop.f32.mrb[0].mxu0 }
 0x100   :  { %v147_v7 = vsel %vm55_vm1, %v183_v6, 0.0  ;;  %v153_v8 = vmul.f32 %v183_v6, %v183_v6  ;;  %v135_v9 = vpop.f32.mrb[1].mxu0 }
 0x101   :  { %v146_v11 = vsel %vm55_vm1, %v135_v9, 0.0  ;;  %v152_v12 = vmul.f32 %v135_v9, %v135_v9 }
 0x102   :  { %v155_v13 = vsel %vm55_vm1, %v153_v8, 0.0  ;;  %v148_v14 = vadd.f32 %v147_v7, %v146_v11 }
 0x103   :  { %v154_v16 = vsel %vm55_vm1, %v152_v12, 0.0 }
 0x104   :  { %v149_v17 = vadd.f32 %v148_v14, %v144_v10  ;;  %v156_v18 = vadd.f32 %v155_v13, %v154_v16 }
 0x106   :  { %150 = vst.msk [vmem:[%s318_s2] sm:$0xff] %vm55_vm1, %v149_v17  ;;  %v157_v19 = vadd.f32 %v156_v18, %v151_v15 }
 0x108   :  { %158 = vst.msk [vmem:[%s319_s3] sm:$0xff] %vm55_vm1, %v157_v19 }
 0x109   :  { %167 = vsyncpa [#allocation3], 1 }
 0x10a   :  { %168 = vsyncpa [#allocation5], 1 }

</bundles_post_ra>
